<compile_context>
chip_gen: v7x
topology: tpu7x:2x2x1
jax: 0.10.0
libtpu: 0.0.40
codegen_flags: <defaults>
</compile_context>

<pallas_src>
import jax
import jax.numpy as jnp
from jax.experimental import pallas as pl
from jax.experimental.pallas import tpu as pltpu  # noqa: F401  (TPU backend)

EPS = 1e-5
LANE = 128                    # pad all feature dims to one full vreg lane width
P_ROWS = 3 * LANE + 8         # w1 | w2 | w3 | 8 rows of per-feature vectors (g1,be1,g2,be2,b3,pad)


def _bn_relu(h, gamma, beta, inv_n):
    """Training-mode BatchNorm1d + ReLU, folded to a single FMA per element.

    One pass over h: sum and sum-of-squares; biased variance = E[h^2] - mean^2.
    Zero-padded feature columns stay exactly zero (gamma/beta pads are zero).
    """
    s = jnp.sum(h, axis=0, keepdims=True)
    sq = jnp.sum(h * h, axis=0, keepdims=True)
    mean = s * inv_n
    var = sq * inv_n - mean * mean
    scale = gamma * jax.lax.rsqrt(var + EPS)
    shift = beta - mean * scale
    return jnp.maximum(h * scale + shift, 0.0)


def make_mlp3_kernel(n_rows):
    inv_n = 1.0 / float(n_rows)

    def mlp3_kernel(x_ref, p_ref, o_ref):
        x = x_ref[...]                                   # (N, 128) f32, already lane-padded

        w1 = p_ref[0 * LANE:1 * LANE, :]                 # (128, 128)
        w2 = p_ref[1 * LANE:2 * LANE, :]                 # (128, 128)
        w3 = p_ref[2 * LANE:3 * LANE, :]                 # (128, 128)
        vecs = p_ref[3 * LANE:3 * LANE + 8, :]           # (8, 128): g1, be1, g2, be2, b3, pad
        g1 = vecs[0:1, :]
        be1 = vecs[1:2, :]
        g2 = vecs[2:3, :]
        be2 = vecs[3:4, :]
        b3 = vecs[4:5, :]

        # Layer 1: Linear (bias omitted -- cancelled by BN mean) -> BN -> ReLU
        h = jnp.dot(x, w1, preferred_element_type=jnp.float32)
        h = _bn_relu(h, g1, be1, inv_n)

        # Layer 2: Linear (bias omitted) -> BN -> ReLU
        h = jnp.dot(h, w2, preferred_element_type=jnp.float32)
        h = _bn_relu(h, g2, be2, inv_n)

        # Layer 3: Linear with bias (rides the final add)
        o_ref[...] = jnp.dot(h, w3, preferred_element_type=jnp.float32) + b3

    return mlp3_kernel


def pack_params(params, input_size, hidden_size, output_size):
    """Pack all parameters into one zero-padded (P_ROWS, 128) f32 slab (single DMA)."""
    slab = jnp.zeros((P_ROWS, LANE), jnp.float32)
    slab = slab.at[0:input_size, 0:hidden_size].set(params["w1"])
    slab = slab.at[LANE:LANE + hidden_size, 0:hidden_size].set(params["w2"])
    slab = slab.at[2 * LANE:2 * LANE + hidden_size, 0:output_size].set(params["w3"])
    slab = slab.at[3 * LANE + 0, 0:hidden_size].set(params["g1"][0])
    slab = slab.at[3 * LANE + 1, 0:hidden_size].set(params["be1"][0])
    slab = slab.at[3 * LANE + 2, 0:hidden_size].set(params["g2"][0])
    slab = slab.at[3 * LANE + 3, 0:hidden_size].set(params["be2"][0])
    slab = slab.at[3 * LANE + 4, 0:output_size].set(params["b3"][0])
    return slab


def mlp3_forward(x, params):
    """x: (N, input_size) float32. params: dict from init_params."""
    N, F = x.shape
    H = params["w1"].shape[1]
    OUT = params["w3"].shape[1]
    assert F <= LANE and H <= LANE and OUT <= LANE, "feature dims must fit one lane tile"

    # Lane-pad the activation input to a full 128-lane slab.
    x_pad = jnp.zeros((N, LANE), jnp.float32).at[:, :F].set(x.astype(jnp.float32))
    slab = pack_params(params, F, H, OUT)

    out_pad = pl.pallas_call(
        make_mlp3_kernel(N),
        out_shape=jax.ShapeDtypeStruct((N, LANE), jnp.float32),
        grid=(),  # overhead-bound at these shapes: single step, no pipelining
        in_specs=[
            pl.BlockSpec((N, LANE), lambda: (0, 0)),
            pl.BlockSpec((P_ROWS, LANE), lambda: (0, 0)),
        ],
        out_specs=pl.BlockSpec((N, LANE), lambda: (0, 0)),
    )(x_pad, slab)
    # TODO(synk): if N is scaled up (v7x dual-core), add a batch grid with an explicit
    # cross-block BN reduction (two-pass or shared-memory partials) to keep full-batch stats.
    return out_pad[:, :OUT]


def init_params(key, input_size, output_size, hidden_size=32):
    """PyTorch-default-style init. Linear weights stored transposed (in, out)."""
    ks = jax.random.split(key, 6)

    def linear(kw, kb, fan_in, fan_out):
        bound = 1.0 / (fan_in ** 0.5)
        w = jax.random.uniform(kw, (fan_in, fan_out), jnp.float32, -bound, bound)
        b = jax.random.uniform(kb, (1, fan_out), jnp.float32, -bound, bound)
        return w, b

    w1, b1 = linear(ks[0], ks[1], input_size, hidden_size)
    w2, b2 = linear(ks[2], ks[3], hidden_size, hidden_size)
    w3, b3 = linear(ks[4], ks[5], hidden_size, output_size)

    return dict(
        w1=w1, b1=b1,
        g1=jnp.ones((1, hidden_size), jnp.float32),
        be1=jnp.zeros((1, hidden_size), jnp.float32),
        w2=w2, b2=b2,
        g2=jnp.ones((1, hidden_size), jnp.float32),
        be2=jnp.zeros((1, hidden_size), jnp.float32),
        w3=w3, b3=b3,
    )


def mlp3_reference(x, p):
    """Pure-JAX reference of the PyTorch forward (training-mode BatchNorm), biases included."""
    def bn_relu(h, g, b):
        m = jnp.mean(h, axis=0, keepdims=True)
        v = jnp.mean((h - m) ** 2, axis=0, keepdims=True)
        return jnp.maximum((h - m) / jnp.sqrt(v + EPS) * g + b, 0.0)

    h = x @ p["w1"] + p["b1"]
    h = bn_relu(h, p["g1"], p["be1"])
    h = h @ p["w2"] + p["b2"]
    h = bn_relu(h, p["g2"], p["be2"])
    return h @ p["w3"] + p["b3"]


if __name__ == "__main__":
    # Small shapes consistent with the module: batch=8, input=16, hidden=32, output=8
    N, INPUT, HIDDEN, OUTPUT = 8, 16, 32, 8

    key = jax.random.PRNGKey(0)
    k_x, k_p = jax.random.split(key)
    x = jax.random.normal(k_x, (N, INPUT), jnp.float32)
    params = init_params(k_p, INPUT, OUTPUT, HIDDEN)

    out = mlp3_forward(x, params)
    out = jax.block_until_ready(out)

    ref = mlp3_reference(x, params)
    assert out.shape == (N, OUTPUT), out.shape
    assert jnp.allclose(out, ref, atol=1e-4, rtol=1e-4), float(jnp.max(jnp.abs(out - ref)))

    print("KERNEL_OK")
</pallas_src>

<mosaic_0001>
module attributes {stable_mosaic.version = 11 : i64} {
  func.func @mlp3_kernel(%arg0: memref<8x128xf32, #tpu.memory_space<vmem>>, %arg1: memref<392x128xf32, #tpu.memory_space<vmem>>, %arg2: memref<8x128xf32, #tpu.memory_space<vmem>>) attributes {dimension_semantics = [], scalar_prefetch = 0 : i64, scratch_operands = 0 : i64, tpu.core_type = #tpu.core_type<tc>} {
    %c0 = arith.constant 0 : index
    %c0_0 = arith.constant 0 : index
    %0 = vector.load %arg0[%c0, %c0_0] : memref<8x128xf32, #tpu.memory_space<vmem>>, vector<8x128xf32>
    %c0_1 = arith.constant 0 : index
    %c0_2 = arith.constant 0 : index
    %1 = vector.load %arg1[%c0_1, %c0_2] : memref<392x128xf32, #tpu.memory_space<vmem>>, vector<128x128xf32>
    %c128 = arith.constant 128 : index
    %c0_3 = arith.constant 0 : index
    %2 = vector.load %arg1[%c128, %c0_3] : memref<392x128xf32, #tpu.memory_space<vmem>>, vector<128x128xf32>
    %c256 = arith.constant 256 : index
    %c0_4 = arith.constant 0 : index
    %3 = vector.load %arg1[%c256, %c0_4] : memref<392x128xf32, #tpu.memory_space<vmem>>, vector<128x128xf32>
    %c384 = arith.constant 384 : index
    %c0_5 = arith.constant 0 : index
    %4 = vector.load %arg1[%c384, %c0_5] : memref<392x128xf32, #tpu.memory_space<vmem>>, vector<8x128xf32>
    %5 = vector.extract_strided_slice %4 {offsets = [0, 0], sizes = [1, 128], strides = [1, 1]} : vector<8x128xf32> to vector<1x128xf32>
    %6 = vector.extract_strided_slice %4 {offsets = [1, 0], sizes = [1, 128], strides = [1, 1]} : vector<8x128xf32> to vector<1x128xf32>
    %7 = vector.extract_strided_slice %4 {offsets = [2, 0], sizes = [1, 128], strides = [1, 1]} : vector<8x128xf32> to vector<1x128xf32>
    %8 = vector.extract_strided_slice %4 {offsets = [3, 0], sizes = [1, 128], strides = [1, 1]} : vector<8x128xf32> to vector<1x128xf32>
    %9 = vector.extract_strided_slice %4 {offsets = [4, 0], sizes = [1, 128], strides = [1, 1]} : vector<8x128xf32> to vector<1x128xf32>
    %cst = arith.constant dense<0.000000e+00> : vector<8x128xf32>
    %10 = tpu.matmul %0, %1, %cst {dimension_numbers = #tpu.dot_dimension_numbers<[1], [0], [0], [1], [0, 0, 1, 1], [], []>} : vector<8x128xf32>, vector<128x128xf32>, vector<8x128xf32> -> vector<8x128xf32>
    %cst_6 = arith.constant dense<0.000000e+00> : vector<128xf32>
    %11 = vector.multi_reduction <add>, %10, %cst_6 [0] : vector<8x128xf32> to vector<128xf32>
    %12 = vector.shape_cast %11 : vector<128xf32> to vector<1x128xf32>
    %13 = arith.mulf %10, %10 : vector<8x128xf32>
    %cst_7 = arith.constant dense<0.000000e+00> : vector<128xf32>
    %14 = vector.multi_reduction <add>, %13, %cst_7 [0] : vector<8x128xf32> to vector<128xf32>
    %15 = vector.shape_cast %14 : vector<128xf32> to vector<1x128xf32>
    %cst_8 = arith.constant 1.250000e-01 : f32
    %16 = vector.broadcast %cst_8 : f32 to vector<1x128xf32>
    %17 = arith.mulf %12, %16 : vector<1x128xf32>
    %cst_9 = arith.constant 1.250000e-01 : f32
    %18 = vector.broadcast %cst_9 : f32 to vector<1x128xf32>
    %19 = arith.mulf %15, %18 : vector<1x128xf32>
    %20 = arith.mulf %17, %17 : vector<1x128xf32>
    %21 = arith.subf %19, %20 : vector<1x128xf32>
    %cst_10 = arith.constant 9.99999974E-6 : f32
    %22 = vector.broadcast %cst_10 : f32 to vector<1x128xf32>
    %23 = arith.addf %21, %22 : vector<1x128xf32>
    %24 = math.rsqrt %23 : vector<1x128xf32>
    %25 = arith.mulf %5, %24 : vector<1x128xf32>
    %26 = arith.mulf %17, %25 : vector<1x128xf32>
    %27 = arith.subf %6, %26 : vector<1x128xf32>
    %28 = vector.broadcast %25 : vector<1x128xf32> to vector<8x128xf32>
    %29 = arith.mulf %10, %28 : vector<8x128xf32>
    %30 = vector.broadcast %27 : vector<1x128xf32> to vector<8x128xf32>
    %31 = arith.addf %29, %30 : vector<8x128xf32>
    %cst_11 = arith.constant 0.000000e+00 : f32
    %32 = vector.broadcast %cst_11 : f32 to vector<8x128xf32>
    %33 = arith.maximumf %31, %32 : vector<8x128xf32>
    %cst_12 = arith.constant dense<0.000000e+00> : vector<8x128xf32>
    %34 = tpu.matmul %33, %2, %cst_12 {dimension_numbers = #tpu.dot_dimension_numbers<[1], [0], [0], [1], [0, 0, 1, 1], [], []>} : vector<8x128xf32>, vector<128x128xf32>, vector<8x128xf32> -> vector<8x128xf32>
    %cst_13 = arith.constant dense<0.000000e+00> : vector<128xf32>
    %35 = vector.multi_reduction <add>, %34, %cst_13 [0] : vector<8x128xf32> to vector<128xf32>
    %36 = vector.shape_cast %35 : vector<128xf32> to vector<1x128xf32>
    %37 = arith.mulf %34, %34 : vector<8x128xf32>
    %cst_14 = arith.constant dense<0.000000e+00> : vector<128xf32>
    %38 = vector.multi_reduction <add>, %37, %cst_14 [0] : vector<8x128xf32> to vector<128xf32>
    %39 = vector.shape_cast %38 : vector<128xf32> to vector<1x128xf32>
    %cst_15 = arith.constant 1.250000e-01 : f32
    %40 = vector.broadcast %cst_15 : f32 to vector<1x128xf32>
    %41 = arith.mulf %36, %40 : vector<1x128xf32>
    %cst_16 = arith.constant 1.250000e-01 : f32
    %42 = vector.broadcast %cst_16 : f32 to vector<1x128xf32>
    %43 = arith.mulf %39, %42 : vector<1x128xf32>
    %44 = arith.mulf %41, %41 : vector<1x128xf32>
    %45 = arith.subf %43, %44 : vector<1x128xf32>
    %cst_17 = arith.constant 9.99999974E-6 : f32
    %46 = vector.broadcast %cst_17 : f32 to vector<1x128xf32>
    %47 = arith.addf %45, %46 : vector<1x128xf32>
    %48 = math.rsqrt %47 : vector<1x128xf32>
    %49 = arith.mulf %7, %48 : vector<1x128xf32>
    %50 = arith.mulf %41, %49 : vector<1x128xf32>
    %51 = arith.subf %8, %50 : vector<1x128xf32>
    %52 = vector.broadcast %49 : vector<1x128xf32> to vector<8x128xf32>
    %53 = arith.mulf %34, %52 : vector<8x128xf32>
    %54 = vector.broadcast %51 : vector<1x128xf32> to vector<8x128xf32>
    %55 = arith.addf %53, %54 : vector<8x128xf32>
    %cst_18 = arith.constant 0.000000e+00 : f32
    %56 = vector.broadcast %cst_18 : f32 to vector<8x128xf32>
    %57 = arith.maximumf %55, %56 : vector<8x128xf32>
    %cst_19 = arith.constant dense<0.000000e+00> : vector<8x128xf32>
    %58 = tpu.matmul %57, %3, %cst_19 {dimension_numbers = #tpu.dot_dimension_numbers<[1], [0], [0], [1], [0, 0, 1, 1], [], []>} : vector<8x128xf32>, vector<128x128xf32>, vector<8x128xf32> -> vector<8x128xf32>
    %59 = vector.broadcast %9 : vector<1x128xf32> to vector<8x128xf32>
    %60 = arith.addf %58, %59 : vector<8x128xf32>
    %c0_20 = arith.constant 0 : index
    %c0_21 = arith.constant 0 : index
    %61 = vector.load %arg2[%c0_20, %c0_21] : memref<8x128xf32, #tpu.memory_space<vmem>>, vector<8x128xf32>
    tpu.vector_store %arg2[%c0_20, %c0_21], %60 {strides = array<i32>} : memref<8x128xf32, #tpu.memory_space<vmem>>, vector<8x128xf32>,
    return
  }
}

</mosaic_0001>

<bundles_post_ra>
// kernel: tpu_custom_call.1
= control target key start
LH: loop header
LB: loop body
LE: loop exit
PB: predicated region body
PF: predicated region fallthrough
CT: control target
= control target key end

     0   :  { %7 = vsyncpa [#allocation3], 0  ;;  %s810_s0 = inlined_call_operand.hbm [shape: f32[8,128], index: 0, kind: input, shape index: {}]   ;;  %s811_s1 = inlined_call_operand.hbm [shape: f32[392,128], index: 1, kind: input, shape index: {}]   ;;  %s812_s2 = inlined_call_operand.hbm [shape: f32[8,128], index: 2, kind: output, shape index: {}]  }
   0x1   :  { %8 = vsyncpa [#allocation6], 0 }
   0x2   :  { %9 = vsyncpa [#allocation4], 0  ;;  %s703_s9 = smov [#allocation2]   ;;  %s704_s11 = smov [#allocation5]  }
   0x3   :  { %s16_s10 = sshll.u32 %s703_s9, 4  ;;  %s25_s12 = sshll.u32 %s704_s11, 4  ;;  %s17_s10 = int_to_ptr.vmem [resolvable:$true] %s16_s10  ;;  %s726_s12 = int_to_ptr.vmem [resolvable:$true] %s25_s12 }
   0x4   :  { %s631_s15 = scalar_lea.hbm %s810_s0, 128 }
   0x5   :  { %p632_p0 = scmp.ne.s32.totalorder %s810_s0, %s631_s15  ;;  %p635_p1 = scmp.lt.u32.totalorder %s631_s15, %s810_s0 }
   0x7   :  { %p637_p2 = pnand %p635_p1, %p632_p0 }
   0x9   :  { %640 = shalt.err (!%p637_p2)
}
   0xa   :  { %s641_s20 = scalar_lea.vmem %s17_s10, 128  ;;  %p646_p4 = scmp.lt.s32.totalorder %s17_s10, %s17_s10 }
   0xb   :  { %p642_p3 = scmp.ne.s32.totalorder %s17_s10, %s641_s20  ;;  %p647_p5 = scmp.lt.s32.totalorder %s641_s20, %s641_s20 }
   0xd   :  { %p648_p6 = por %p647_p5, %p646_p4 }
   0xf   :  { %p649_p7 = pnand %p648_p6, %p642_p3 }
  0x11   :  { %652 = shalt.err (!%p649_p7)
}
  0x12   :  { %19 = dma.hbm_to_vmem [thread:$0]  %s810_s0, 128, %s17_s10, [#allocation3]  }
  0x13   :  { %s653_s25 = scalar_lea.hbm %s811_s1, 6272 }
  0x14   :  { %p654_p8 = scmp.ne.s32.totalorder %s811_s1, %s653_s25  ;;  %p657_p9 = scmp.lt.u32.totalorder %s653_s25, %s811_s1 }
  0x16   :  { %p659_p10 = pnand %p657_p9, %p654_p8 }
  0x18   :  { %662 = shalt.err (!%p659_p10)
}
  0x19   :  { %s663_s30 = scalar_lea.vmem %s726_s12, 6272  ;;  %p668_p12 = scmp.lt.s32.totalorder %s726_s12, %s726_s12 }
  0x1a   :  { %p664_p11 = scmp.ne.s32.totalorder %s726_s12, %s663_s30  ;;  %p669_p13 = scmp.lt.s32.totalorder %s663_s30, %s663_s30 }
  0x1c   :  { %p670_p0 = por %p669_p13, %p668_p12 }
  0x1e   :  { %p671_p1 = pnand %p670_p0, %p664_p11 }
  0x20   :  { %674 = shalt.err (!%p671_p1)
}
  0x21   :  { %s705_s0 = smov 128   ;;  %s706_s3 = smov 8  }
  0x22   :  { %31 = dma.hbm_to_vmem [thread:$0]  %s811_s1, 6272, %s726_s12, [#allocation6], %s705_s0, %s705_s0, %s706_s3  }
  0x23   :  { %697 = dma.done.wait [#allocation3], 128  }
  0x24   :  { %698 = vsyncadd [#allocation3], 4294967168 }
  0x25   :  { %699 = dma.done.wait [#allocation6], 6272  }
  0x26   :  { %700 = vsyncadd [#allocation6], 4294961024  ;;  %v707_v0 = vmov 0.0|0.0   ;;  %vm708_vm0 = vmmov 0   ;;  %v709_v1 = vmov 0.0   ;;  %v39_v2 = vld [vmem:[#allocation5] sm:$0xff] }
  0x27   :  { %547 = vmatprep.subr.bf16.mxu0 %v707_v0  ;;  %474 = vmatprep.mubr.msk.f32.mxu0 %vm708_vm0, %v709_v1  ;;  %v40_v3 = vld [vmem:[#allocation5 + $0x8] sm:$0xff]  ;;  %v41_v4 = vld [vmem:[#allocation5 + $0x10] sm:$0xff]  ;;  %v42_v6 = vld [vmem:[#allocation5 + $0x18] sm:$0xff]  ;;  %s710_s1 = smov [#allocation7]  }
  0x28   :  { %571 = vmatprep.subr.bf16.mxu1 %v707_v0  ;;  %509 = vmatprep.mubr.msk.f32.mxu1 %vm708_vm0, %v709_v1  ;;  %v548_v5 = vpack.c.bf16 %v40_v3, %v39_v2  ;;  %v551_v7 = vpack.c.bf16 %v42_v6, %v41_v4  ;;  %v43_v8 = vld [vmem:[#allocation5 + $0x20] sm:$0xff]  ;;  %v44_v9 = vld [vmem:[#allocation5 + $0x28] sm:$0xff]  ;;  %v45_v11 = vld [vmem:[#allocation5 + $0x30] sm:$0xff]  ;;  %s381_s6 = sshll.u32 %s710_s1, 4  ;;  %s382_s6 = int_to_ptr.vmem [resolvable:$true] %s381_s6 }
  0x29   :  { %v554_v10 = vpack.c.bf16 %v44_v9, %v43_v8  ;;  %v46_v12 = vld [vmem:[#allocation5 + $0x38] sm:$0xff]  ;;  %v47_v14 = vld [vmem:[#allocation5 + $0x40] sm:$0xff]  ;;  %v48_v15 = vld [vmem:[#allocation5 + $0x48] sm:$0xff]  ;;  %v183_v8 = vlaneseq  ;;  %s675_s7 = scalar_lea.vmem %s382_s6, 128  ;;  %p680_p3 = scmp.lt.s32.totalorder %s382_s6, %s382_s6 }
  0x2a   :  { %549 = vmatpush3.bf16.msra.mxu0 %v548_v5  ;;  %v557_v13 = vpack.c.bf16 %v46_v12, %v45_v11  ;;  %v560_v16 = vpack.c.bf16 %v48_v15, %v47_v14  ;;  %v49_v17 = vld [vmem:[#allocation5 + $0x50] sm:$0xff]  ;;  %v50_v18 = vld [vmem:[#allocation5 + $0x58] sm:$0xff]  ;;  %v51_v20 = vld [vmem:[#allocation5 + $0x60] sm:$0xff]  ;;  %p676_p2 = scmp.ne.s32.totalorder %s382_s6, %s675_s7  ;;  %p681_p4 = scmp.lt.s32.totalorder %s675_s7, %s675_s7 }
  0x2b   :  { %550 = vmatprep.subr.bf16.mxu0 %v707_v0  ;;  %v563_v19 = vpack.c.bf16 %v50_v18, %v49_v17  ;;  %v52_v21 = vld [vmem:[#allocation5 + $0x68] sm:$0xff]  ;;  %v53_v23 = vld [vmem:[#allocation5 + $0x70] sm:$0xff]  ;;  %v54_v24 = vld [vmem:[#allocation5 + $0x78] sm:$0xff]  ;;  %v777_v9 = vshrl.u32 %v183_v8, 7 }
  0x2c   :  { %v566_v22 = vpack.c.bf16 %v52_v21, %v51_v20  ;;  %v569_v25 = vpack.c.bf16 %v54_v24, %v53_v23  ;;  %v38_v26 = vld [vmem:[#allocation2] sm:$0xff]  ;;  %v55_v27 = vld [vmem:[#allocation5 + $0x80] sm:$0xff]  ;;  %v56_v28 = vld [vmem:[#allocation5 + $0x88] sm:$0xff]  ;;  %p682_p5 = por %p681_p4, %p680_p3 }
  0x2d   :  { %v572_v29 = vpack.c.bf16 %v56_v28, %v55_v27  ;;  %v57_v30 = vld [vmem:[#allocation5 + $0x90] sm:$0xff]  ;;  %v58_v31 = vld [vmem:[#allocation5 + $0x98] sm:$0xff]  ;;  %v59_v33 = vld [vmem:[#allocation5 + $0xa0] sm:$0xff]  ;;  %v190_v17 = vsub.s32 1, %v777_v9 }
  0x2e   :  { %552 = vmatpush3.bf16.msra.mxu0 %v551_v7  ;;  %v575_v32 = vpack.c.bf16 %v58_v31, %v57_v30  ;;  %v60_v34 = vld [vmem:[#allocation5 + $0xa8] sm:$0xff]  ;;  %v61_v36 = vld [vmem:[#allocation5 + $0xb0] sm:$0xff]  ;;  %v62_v37 = vld [vmem:[#allocation5 + $0xb8] sm:$0xff]  ;;  %p683_p6 = pnand %p682_p5, %p676_p2 }
  0x2f   :  { %553 = vmatprep.subr.bf16.mxu0 %v707_v0  ;;  %573 = vmatpush3.bf16.msra.mxu1 %v572_v29  ;;  %v578_v35 = vpack.c.bf16 %v60_v34, %v59_v33  ;;  %v581_v38 = vpack.c.bf16 %v62_v37, %v61_v36  ;;  %v63_v39 = vld [vmem:[#allocation5 + $0xc0] sm:$0xff]  ;;  %v64_v40 = vld [vmem:[#allocation5 + $0xc8] sm:$0xff]  ;;  %v65_v42 = vld [vmem:[#allocation5 + $0xd0] sm:$0xff] }
  0x30   :  { %574 = vmatprep.subr.bf16.mxu1 %v707_v0  ;;  %v584_v41 = vpack.c.bf16 %v64_v40, %v63_v39  ;;  %v66_v43 = vld [vmem:[#allocation5 + $0xd8] sm:$0xff]  ;;  %v67_v45 = vld [vmem:[#allocation5 + $0xe0] sm:$0xff]  ;;  %v68_v46 = vld [vmem:[#allocation5 + $0xe8] sm:$0xff] }
  0x31   :  { %v587_v44 = vpack.c.bf16 %v66_v43, %v65_v42  ;;  %v69_v47 = vld [vmem:[#allocation5 + $0xf0] sm:$0xff]  ;;  %v590_v48 = vpack.c.bf16 %v68_v46, %v67_v45  ;;  %v70_v49 = vld [vmem:[#allocation5 + $0xf8] sm:$0xff]  ;;  %v71_v23 = vld [vmem:[#allocation5 + $0x100] sm:$0xff] }
  0x32   :  { %555 = vmatpush3.bf16.msra.mxu0 %v554_v10  ;;  %v593_v50 = vpack.c.bf16 %v70_v49, %v69_v47  ;;  %v779_v10 = vld [vmem:[#allocation5 + $0x180] sm:$0xff]  ;;  %v72_v24 = vld [vmem:[#allocation5 + $0x108] sm:$0xff]  ;;  %v74_v27 = vld [vmem:[#allocation5 + $0x118] sm:$0xff] }
  0x33   :  { %556 = vmatprep.subr.bf16.mxu0 %v707_v0  ;;  %576 = vmatpush3.bf16.msra.mxu1 %v575_v32  ;;  %v75_v29 = vld [vmem:[#allocation5 + $0x120] sm:$0xff]  ;;  %v76_v30 = vld [vmem:[#allocation5 + $0x128] sm:$0xff]  ;;  %v77_v32 = vld [vmem:[#allocation5 + $0x130] sm:$0xff] }
  0x34   :  { %577 = vmatprep.subr.bf16.mxu1 %v707_v0  ;;  %v602_v31 = vpack.c.bf16 %v76_v30, %v75_v29  ;;  %v78_v33 = vld [vmem:[#allocation5 + $0x138] sm:$0xff]  ;;  %v80_v36 = vld [vmem:[#allocation5 + $0x148] sm:$0xff] }
  0x35   :  { %v605_v34 = vpack.c.bf16 %v78_v33, %v77_v32  ;;  %v82_v39 = vld [vmem:[#allocation5 + $0x158] sm:$0xff]  ;;  %v84_v42 = vld [vmem:[#allocation5 + $0x168] sm:$0xff] }
  0x36   :  { %558 = vmatpush3.bf16.msra.mxu0 %v557_v13  ;;  %v185_v13 = vsub.s32 0, %v777_v9  ;;  %v86_v45 = vld [vmem:[#allocation5 + $0x178] sm:$0xff] }
  0x37   :  { %559 = vmatprep.subr.bf16.mxu0 %v707_v0  ;;  %579 = vmatpush3.bf16.msra.mxu1 %v578_v35  ;;  %v79_v35 = vld [vmem:[#allocation5 + $0x140] sm:$0xff] }
  0x38   :  { %580 = vmatprep.subr.bf16.mxu1 %v707_v0  ;;  %v608_v37 = vpack.c.bf16 %v80_v36, %v79_v35 }
  0x3a   :  { %561 = vmatpush3.bf16.msra.mxu0 %v560_v16 }
  0x3b   :  { %562 = vmatprep.subr.bf16.mxu0 %v707_v0  ;;  %582 = vmatpush3.bf16.msra.mxu1 %v581_v38  ;;  %v81_v38 = vld [vmem:[#allocation5 + $0x150] sm:$0xff] }
  0x3c   :  { %583 = vmatprep.subr.bf16.mxu1 %v707_v0  ;;  %v611_v40 = vpack.c.bf16 %v82_v39, %v81_v38 }
  0x3e   :  { %564 = vmatpush3.bf16.msra.mxu0 %v563_v19 }
  0x3f   :  { %565 = vmatprep.subr.bf16.mxu0 %v707_v0  ;;  %585 = vmatpush3.bf16.msra.mxu1 %v584_v41  ;;  %v83_v41 = vld [vmem:[#allocation5 + $0x160] sm:$0xff] }
  0x40   :  { %586 = vmatprep.subr.bf16.mxu1 %v707_v0  ;;  %v614_v43 = vpack.c.bf16 %v84_v42, %v83_v41 }
  0x42   :  { %567 = vmatpush3.bf16.msra.mxu0 %v566_v22 }
  0x43   :  { %568 = vmatprep.subr.bf16.mxu0 %v707_v0  ;;  %588 = vmatpush3.bf16.msra.mxu1 %v587_v44  ;;  %v85_v44 = vld [vmem:[#allocation5 + $0x170] sm:$0xff] }
  0x44   :  { %589 = vmatprep.subr.bf16.mxu1 %v707_v0  ;;  %v617_v46 = vpack.c.bf16 %v86_v45, %v85_v44 }
  0x46   :  { %570 = vmatpush3.bf16.msra.mxu0 %v569_v25  ;;  %v596_v25 = vpack.c.bf16 %v72_v24, %v71_v23 }
  0x47   :  { %595 = vmatprep.subr.bf16.mxu0 %v707_v0  ;;  %591 = vmatpush3.bf16.msra.mxu1 %v590_v48 }
  0x48   :  { %592 = vmatprep.subr.bf16.mxu1 %v707_v0 }
  0x49   :  { %475 = vmatmul.mubr.f32.vlgmr.msra.gmra.mrb[0].mxu0 %v38_v26  ;;  %v73_v26 = vld [vmem:[#allocation5 + $0x110] sm:$0xff] }
  0x4a   :  { %544 = vmatprep.mubr.msk.f32.mxu0 %vm708_vm0, %v709_v1  ;;  %597 = vmatpush3.bf16.msra.mxu0 %v596_v25  ;;  %v599_v28 = vpack.c.bf16 %v74_v27, %v73_v26 }
  0x4b   :  { %594 = vmatpush3.bf16.msra.mxu1 %v593_v50  ;;  %598 = vmatprep.subr.bf16.mxu0 %v707_v0 }
  0x4e   :  { %600 = vmatpush3.bf16.msra.mxu0 %v599_v28 }
  0x4f   :  { %601 = vmatprep.subr.bf16.mxu0 %v707_v0 }
  0x52   :  { %603 = vmatpush3.bf16.msra.mxu0 %v602_v31 }
  0x53   :  { %604 = vmatprep.subr.bf16.mxu0 %v707_v0 }
  0x56   :  { %606 = vmatpush3.bf16.msra.mxu0 %v605_v34 }
  0x57   :  { %607 = vmatprep.subr.bf16.mxu0 %v707_v0 }
  0x5a   :  { %609 = vmatpush3.bf16.msra.mxu0 %v608_v37 }
  0x5b   :  { %610 = vmatprep.subr.bf16.mxu0 %v707_v0 }
  0x5e   :  { %612 = vmatpush3.bf16.msra.mxu0 %v611_v40 }
  0x5f   :  { %613 = vmatprep.subr.bf16.mxu0 %v707_v0 }
  0x62   :  { %615 = vmatpush3.bf16.msra.mxu0 %v614_v43 }
  0x63   :  { %616 = vmatprep.subr.bf16.mxu0 %v707_v0 }
  0x66   :  { %618 = vmatpush3.bf16.msra.mxu0 %v617_v46 }
 0x11c   :  { %v154_v51 = vpop.f32.mrb[0].mxu0 }
 0x11d   :  { %v158_v52 = vrot.slane %v154_v51, 4  ;;  %v164_v53 = vmul.f32 %v154_v51, %v154_v51  ;;  %v476_v54 = vpop.f32.mrb[1].mxu0 }
 0x11f   :  { %v159_v55 = vadd.f32 %v158_v52, %v154_v51  ;;  %v165_v56 = vrot.slane %v164_v53, 4 }
 0x121   :  { %v160_v57 = vrot.slane %v159_v55, 2  ;;  %v166_v58 = vadd.f32 %v165_v56, %v164_v53 }
 0x123   :  { %v161_v59 = vadd.f32 %v160_v57, %v159_v55  ;;  %v167_v60 = vrot.slane %v166_v58, 2 }
 0x125   :  { %v162_v61 = vrot.slane %v161_v59, 1  ;;  %v168_v62 = vadd.f32 %v167_v60, %v166_v58 }
 0x127   :  { %v163_v63 = vadd.f32 %v162_v61, %v161_v59  ;;  %v169_v1 = vrot.slane %v168_v62, 1 }
 0x129   :  { %v170_v2 = vadd.f32 %v169_v1, %v168_v62  ;;  %v171_v3 = vmul.f32 0.125, %v163_v63 }
 0x12b   :  { %v172_v4 = vmul.f32 0.125, %v170_v2  ;;  %v173_v5 = vmul.f32 %v171_v3, %v171_v3 }
 0x12d   :  { %v174_v6 = vsub.f32 %v172_v4, %v173_v5  ;;  %v291_v5 = vsub.s32 2, %v777_v9 }
 0x12f   :  { %v175_v7 = vadd.f32 1e-05, %v174_v6 }
 0x131   :  { %627 = vrsqrt.f32 %v175_v7 }
 0x13b   :  { %v628_v11 = vpop.eup %627 }
 0x13c   :  { %v177_v12 = vmul.f32 %v628_v11, %v779_v10  ;;  %v296_v11 = vsub.s32 3, %v777_v9 }
 0x13e   :  { %v178_v14 = vmul.f32 %v177_v12, %v171_v3  ;;  %v186_v15 = vrot.slane %v177_v12, %v185_v13 }
 0x140   :  { %v180_v16 = vrot.slane %v178_v14, 7  ;;  %v187_v19 = vmul.f32 %v186_v15, %v154_v51 }
 0x142   :  { %v182_v18 = vsub.f32 %v779_v10, %v180_v16 }
 0x144   :  { %v191_v20 = vrot.slane %v182_v18, %v190_v17  ;;  %v302_v17 = vsub.s32 4, %v777_v9 }
 0x146   :  { %v192_v21 = vadd.f32 %v191_v20, %v187_v19  ;;  %v303_v18 = vrot.slane %v779_v10, %v302_v17 }
 0x148   :  { %v193_v22 = vmax.f32 %v192_v21, 0.0 }
 0x14a   :  { %510 = vmatmul.mubr.f32.vlgmr.msra.gmra.mrb[0].mxu1 %v193_v22 }
 0x21d   :  { %v260_v47 = vpop.f32.mrb[0].mxu1 }
 0x21e   :  { %v264_v48 = vrot.slane %v260_v47, 4  ;;  %v270_v49 = vmul.f32 %v260_v47, %v260_v47  ;;  %v511_v50 = vpop.f32.mrb[1].mxu1 }
 0x220   :  { %v265_v51 = vadd.f32 %v264_v48, %v260_v47  ;;  %v271_v52 = vrot.slane %v270_v49, 4 }
 0x222   :  { %v266_v53 = vrot.slane %v265_v51, 2  ;;  %v272_v54 = vadd.f32 %v271_v52, %v270_v49 }
 0x224   :  { %v267_v55 = vadd.f32 %v266_v53, %v265_v51  ;;  %v273_v56 = vrot.slane %v272_v54, 2 }
 0x226   :  { %v268_v57 = vrot.slane %v267_v55, 1  ;;  %v274_v58 = vadd.f32 %v273_v56, %v272_v54 }
 0x228   :  { %v269_v59 = vadd.f32 %v268_v57, %v267_v55  ;;  %v275_v60 = vrot.slane %v274_v58, 1 }
 0x22a   :  { %v276_v61 = vadd.f32 %v275_v60, %v274_v58  ;;  %v277_v0 = vmul.f32 0.125, %v269_v59 }
 0x22c   :  { %v278_v62 = vmul.f32 0.125, %v276_v61  ;;  %v279_v63 = vmul.f32 %v277_v0, %v277_v0 }
 0x22e   :  { %v280_v1 = vsub.f32 %v278_v62, %v279_v63 }
 0x230   :  { %v281_v2 = vadd.f32 1e-05, %v280_v1 }
 0x232   :  { %629 = vrsqrt.f32 %v281_v2 }
 0x23c   :  { %v630_v3 = vpop.eup %629 }
 0x23d   :  { %v283_v4 = vmul.f32 %v630_v3, %v779_v10 }
 0x23f   :  { %v284_v6 = vmul.f32 %v283_v4, %v277_v0  ;;  %v292_v8 = vrot.slane %v283_v4, %v291_v5 }
 0x241   :  { %v286_v7 = vrot.slane %v284_v6, 7  ;;  %v293_v13 = vmul.f32 %v292_v8, %v260_v47 }
 0x243   :  { %v288_v12 = vsub.f32 %v779_v10, %v286_v7 }
 0x245   :  { %v297_v14 = vrot.slane %v288_v12, %v296_v11 }
 0x247   :  { %v298_v15 = vadd.f32 %v297_v14, %v293_v13 }
 0x249   :  { %v299_v16 = vmax.f32 %v298_v15, 0.0 }
 0x24b   :  { %545 = vmatmul.mubr.f32.vlgmr.msra.gmra.mrb[2].mxu0 %v299_v16 }
 0x31e   :  { %v370_v19 = vpop.f32.mrb[2].mxu0 }
 0x31f   :  { %v371_v20 = vadd.f32 %v370_v19, %v303_v18  ;;  %v546_v21 = vpop.f32.mrb[3].mxu0 }
 0x321   :  { %374 = vst [vmem:[#allocation7] sm:$0xff] %v371_v20 }
 0x322   :  { %686 = shalt.err (!%p683_p6)
}
 0x323   :  { %s687_s10 = scalar_lea.hbm %s812_s2, 128 }
 0x324   :  { %p688_p7 = scmp.ne.s32.totalorder %s812_s2, %s687_s10  ;;  %p691_p8 = scmp.lt.u32.totalorder %s687_s10, %s812_s2 }
 0x326   :  { %p693_p9 = pnand %p691_p8, %p688_p7 }
 0x328   :  { %696 = shalt.err (!%p693_p9)
}
 0x329   :  { %384 = dma.vmem_to_hbm [thread:$0]  %s382_s6, 128, %s812_s2, [#allocation4]  }
 0x32a   :  { %701 = dma.done.wait [#allocation4], 128  }
 0x32b   :  { %702 = vsyncadd [#allocation4], 4294967168 }
 0x32c   :  { %388 = vsyncpa [#allocation3], 1 }
 0x32d   :  { %389 = vsyncpa [#allocation6], 1 }
 0x32e   :  { %390 = vsyncpa [#allocation4], 1 }

</bundles_post_ra>
